<compile_context>
chip_gen: v6e
topology: v6e:2x2x1
jax: 0.10.0
libtpu: 0.0.40
codegen_flags: <defaults>
</compile_context>

<pallas_src>
import functools

import jax
import jax.numpy as jnp
from jax.experimental import pallas as pl
from jax.experimental.pallas import tpu as pltpu

_NUM_SPLITS = 2          # leading "parallel" grid axis (2 TCs on v7x)
_EPS = 1e-7


def _proto_distance_loss_kernel(d_ref, l_ref, out_ref, *, tile_n, n_rows,
                                tiles_per_split):
    p = pl.program_id(0)          # split / core index      ("parallel")
    i = pl.program_id(1)          # row-tile within split   ("arbitrary")

    @pl.when(i == 0)
    def _():
        out_ref[...] = jnp.zeros_like(out_ref)

    # Unclamped global tile index -> global row offset of this tile.
    t = p * tiles_per_split + i
    row_start = t * tile_n

    d = d_ref[...].astype(jnp.float32)                       # [tile_n, C]
    mask = l_ref[...] != 0                                   # [tile_n, C] bool

    # Rows past the true N (tail tile / duplicated clamped tile) contribute 0.
    row_ids = jax.lax.broadcasted_iota(jnp.int32, (tile_n, 1), 0) + row_start
    row_valid = row_ids < n_rows                             # [tile_n, 1]

    # pos_loss partial: sum of distances where label is set (valid rows only).
    pos = jnp.sum(jnp.where(jnp.logical_and(mask, row_valid), d, 0.0))

    # neg_loss partial: sum_rows log( sum_cols exp(-d) * (1 - mask) + eps ).
    # exp(-inf) == 0 in the reference -> zero out masked slots.
    # TODO(synk): exp(-d) overflows to inf for very negative distances; this
    # matches the PyTorch reference exactly (log(inf) = inf) and is kept as is.
    neg_exp = jnp.where(mask, 0.0, jnp.exp(-d))              # [tile_n, C]
    row_sum = jnp.sum(neg_exp, axis=1, keepdims=True) + jnp.float32(_EPS)
    neg = jnp.sum(jnp.where(row_valid, jnp.log(row_sum), 0.0))

    # Accumulate into this split's resident output block (all lanes same value).
    out_ref[...] += (pos + neg)


def _choose_tile_n(n, c, d_itemsize):
    # Keep double-buffered (distances + int8 labels) input tiles well under the
    # scoped-VMEM ceiling (conservative for v7x's smaller VMEM).
    budget_bytes = 8 * 1024 * 1024
    bytes_per_row = c * (d_itemsize + 1)
    tn = max(8, min(1024, budget_bytes // (2 * max(1, bytes_per_row))))
    tn = (tn // 8) * 8
    if tn >= n:
        return n          # whole N fits in one row tile (full-dim block is legal)
    return tn


def proto_distance_loss(distances: jax.Array, labels: jax.Array,
                        *, tile_n: int | None = None) -> jax.Array:
    """distances: [N, C] float (any float dtype); labels: [N, C], nonzero == True."""
    n, c = distances.shape
    # Narrow label traffic to 1 byte/elem; (labels != 0) matches torch .to(bool).
    labels_i8 = (labels != 0).astype(jnp.int8)

    if tile_n is None:
        tile_n = _choose_tile_n(n, c, distances.dtype.itemsize)
    num_tiles = pl.cdiv(n, tile_n)
    tiles_per_split = pl.cdiv(num_tiles, _NUM_SPLITS)

    def in_index_map(p, i):
        t = p * tiles_per_split + i
        # Clamp so the DMA never targets a nonexistent block; the kernel masks
        # out rows >= N, so a clamped duplicate tile contributes nothing.
        return (jnp.minimum(t, num_tiles - 1), 0)

    kernel = functools.partial(
        _proto_distance_loss_kernel,
        tile_n=tile_n, n_rows=n, tiles_per_split=tiles_per_split)

    partials = pl.pallas_call(
        kernel,
        out_shape=jax.ShapeDtypeStruct((_NUM_SPLITS, 8, 128), jnp.float32),
        grid=(_NUM_SPLITS, tiles_per_split),
        in_specs=[
            pl.BlockSpec((tile_n, c), in_index_map),
            pl.BlockSpec((tile_n, c), in_index_map),
        ],
        out_specs=pl.BlockSpec((1, 8, 128), lambda p, i: (p, 0, 0)),
        compiler_params=pltpu.CompilerParams(
            dimension_semantics=("parallel", "arbitrary"),
            vmem_limit_bytes=32 * 1024 * 1024,
        ),
    )(distances, labels_i8)

    # Final combine + 1/(N*C) normalization on a handful of scalars.
    return jnp.sum(partials[:, 0, 0]) / jnp.float32(n * c)


def _reference(distances, labels):
    # Pure-JAX reference mirroring the PyTorch forward.
    mask = labels.astype(bool)
    d = distances.astype(jnp.float32)
    pos = jnp.sum(jnp.where(mask, d, 0.0))
    neg = jnp.sum(jnp.log(jnp.sum(jnp.where(mask, 0.0, jnp.exp(-d)), axis=1) + 1e-7))
    return (pos + neg) / (labels.shape[0] * labels.shape[1])


if __name__ == "__main__":
    key = jax.random.PRNGKey(0)
    k1, k2 = jax.random.split(key)

    N, C = 24, 16  # batch of queries x number of prototypes
    distances = jax.random.uniform(k1, (N, C), dtype=jnp.float32) * 5.0
    # one positive prototype per row
    pos_idx = jax.random.randint(k2, (N,), 0, C)
    labels = jax.nn.one_hot(pos_idx, C, dtype=jnp.int32)

    ref = _reference(distances, labels)

    # Auto-tiled path (single row tile at this size, dual split exercised).
    loss = jax.block_until_ready(proto_distance_loss(distances, labels))
    assert jnp.allclose(loss, ref, rtol=1e-5, atol=1e-5), (loss, ref)

    # Explicit small tile: multi-tile accumulation + clamped-tile masking.
    loss_tiled = jax.block_until_ready(
        proto_distance_loss(distances, labels, tile_n=8))
    assert jnp.allclose(loss_tiled, ref, rtol=1e-5, atol=1e-5), (loss_tiled, ref)

    print("KERNEL_OK")
</pallas_src>

<mosaic_0001>
module attributes {stable_mosaic.version = 11 : i64} {
  func.func @_proto_distance_loss_kernel(%arg0: i32, %arg1: i32, %arg2: memref<24x16xf32, #tpu.memory_space<vmem>>, %arg3: memref<24x16xi8, #tpu.memory_space<vmem>>, %arg4: memref<1x8x128xf32, #tpu.memory_space<vmem>>) attributes {dimension_semantics = [#tpu.dimension_semantics<parallel>, #tpu.dimension_semantics<arbitrary>], iteration_bounds = array<i64: 2, 1>, scalar_prefetch = 0 : i64, scratch_operands = 0 : i64, tpu.core_type = #tpu.core_type<tc>, window_params = [{transform_indices = @transform_0, window_bounds = array<i64: 24, 16>}, {transform_indices = @transform_1, window_bounds = array<i64: 24, 16>}, {transform_indices = @transform_2, window_bounds = array<i64: 1, 8, 128>}]} {
    %c0_i32 = arith.constant 0 : i32
    %0 = arith.cmpi eq, %arg1, %c0_i32 : i32
    %1 = arith.extui %0 : i1 to i32
    %c0_i32_0 = arith.constant 0 : i32
    %2 = arith.cmpi ne, %1, %c0_i32_0 : i32
    scf.if %2 {
      %cst_18 = arith.constant 0.000000e+00 : f32
      %44 = vector.broadcast %cst_18 : f32 to vector<1x8x128xf32>
      %c0_19 = arith.constant 0 : index
      %c0_20 = arith.constant 0 : index
      %c0_21 = arith.constant 0 : index
      %45 = vector.load %arg4[%c0_19, %c0_20, %c0_21] : memref<1x8x128xf32, #tpu.memory_space<vmem>>, vector<1x8x128xf32>
      tpu.vector_store %arg4[%c0_19, %c0_20, %c0_21], %44 {strides = array<i32>} : memref<1x8x128xf32, #tpu.memory_space<vmem>>, vector<1x8x128xf32>,
    } else {
    }
    %c1_i32 = arith.constant 1 : i32
    %3 = arith.muli %arg0, %c1_i32 : i32
    %4 = arith.addi %3, %arg1 : i32
    %c24_i32 = arith.constant 24 : i32
    %5 = arith.muli %4, %c24_i32 : i32
    %c0 = arith.constant 0 : index
    %c0_1 = arith.constant 0 : index
    %6 = vector.load %arg2[%c0, %c0_1] : memref<24x16xf32, #tpu.memory_space<vmem>>, vector<24x16xf32>
    %c0_2 = arith.constant 0 : index
    %c0_3 = arith.constant 0 : index
    %7 = vector.load %arg3[%c0_2, %c0_3] : memref<24x16xi8, #tpu.memory_space<vmem>>, vector<24x16xi8>
    %c0_i8 = arith.constant 0 : i8
    %8 = vector.broadcast %c0_i8 : i8 to vector<24x16xi8>
    %9 = arith.cmpi ne, %7, %8 : vector<24x16xi8>
    %10 = tpu.iota {dimensions = array<i32: 0>} : vector<24x1xi32>
    %11 = vector.broadcast %5 : i32 to vector<24x1xi32>
    %12 = arith.addi %10, %11 : vector<24x1xi32>
    %c24_i32_4 = arith.constant 24 : i32
    %13 = vector.broadcast %c24_i32_4 : i32 to vector<24x1xi32>
    %14 = arith.cmpi slt, %12, %13 : vector<24x1xi32>
    %15 = vector.broadcast %14 : vector<24x1xi1> to vector<24x16xi1>
    %16 = arith.andi %9, %15 : vector<24x16xi1>
    %cst = arith.constant 0.000000e+00 : f32
    %17 = vector.broadcast %cst : f32 to vector<24x16xf32>
    %18 = arith.select %16, %6, %17 : vector<24x16xi1>, vector<24x16xf32>
    %19 = vector.shape_cast %18 : vector<24x16xf32> to vector<1x24x16xf32>
    %cst_5 = arith.constant dense<0.000000e+00> : vector<1xf32>
    %20 = vector.multi_reduction <add>, %19, %cst_5 [1, 2] : vector<1x24x16xf32> to vector<1xf32>
    %21 = vector.shape_cast %20 : vector<1xf32> to vector<1x1x1xf32>
    %22 = vector.extract %21[0, 0, 0] : f32 from vector<1x1x1xf32>
    %cst_6 = arith.constant 0.000000e+00 : f32
    %23 = vector.broadcast %cst_6 : f32 to vector<24x16xf32>
    %24 = arith.subf %23, %6 : vector<24x16xf32>
    %25 = math.exp %24 : vector<24x16xf32>
    %cst_7 = arith.constant 0.000000e+00 : f32
    %26 = vector.broadcast %cst_7 : f32 to vector<24x16xf32>
    %27 = arith.select %9, %26, %25 : vector<24x16xi1>, vector<24x16xf32>
    %cst_8 = arith.constant dense<0.000000e+00> : vector<24xf32>
    %28 = vector.multi_reduction <add>, %27, %cst_8 [1] : vector<24x16xf32> to vector<24xf32>
    %29 = vector.shape_cast %28 : vector<24xf32> to vector<24x1xf32>
    %cst_9 = arith.constant 1.000000e-07 : f32
    %30 = vector.broadcast %cst_9 : f32 to vector<24x1xf32>
    %31 = arith.addf %29, %30 : vector<24x1xf32>
    %32 = math.log %31 : vector<24x1xf32>
    %cst_10 = arith.constant 0.000000e+00 : f32
    %33 = vector.broadcast %cst_10 : f32 to vector<24x1xf32>
    %34 = arith.select %14, %32, %33 : vector<24x1xi1>, vector<24x1xf32>
    %35 = vector.shape_cast %34 : vector<24x1xf32> to vector<1x24x1xf32>
    %cst_11 = arith.constant dense<0.000000e+00> : vector<1xf32>
    %36 = vector.multi_reduction <add>, %35, %cst_11 [1, 2] : vector<1x24x1xf32> to vector<1xf32>
    %37 = vector.shape_cast %36 : vector<1xf32> to vector<1x1x1xf32>
    %38 = vector.extract %37[0, 0, 0] : f32 from vector<1x1x1xf32>
    %c0_12 = arith.constant 0 : index
    %c0_13 = arith.constant 0 : index
    %c0_14 = arith.constant 0 : index
    %39 = vector.load %arg4[%c0_12, %c0_13, %c0_14] : memref<1x8x128xf32, #tpu.memory_space<vmem>>, vector<1x8x128xf32>
    %40 = arith.addf %22, %38 : f32
    %41 = vector.broadcast %40 : f32 to vector<1x8x128xf32>
    %42 = arith.addf %39, %41 : vector<1x8x128xf32>
    %c0_15 = arith.constant 0 : index
    %c0_16 = arith.constant 0 : index
    %c0_17 = arith.constant 0 : index
    %43 = vector.load %arg4[%c0_15, %c0_16, %c0_17] : memref<1x8x128xf32, #tpu.memory_space<vmem>>, vector<1x8x128xf32>
    tpu.vector_store %arg4[%c0_15, %c0_16, %c0_17], %42 {strides = array<i32>} : memref<1x8x128xf32, #tpu.memory_space<vmem>>, vector<1x8x128xf32>,
    return
  }
  func.func @transform_0(%arg0: i32, %arg1: i32) -> (i32, i32) {
    %c1_i32 = arith.constant 1 : i32
    %0 = arith.muli %arg0, %c1_i32 : i32
    %1 = arith.addi %0, %arg1 : i32
    %c0_i32 = arith.constant 0 : i32
    %2 = arith.minsi %1, %c0_i32 : i32
    %c0_i32_0 = arith.constant 0 : i32
    %c0_i32_1 = arith.constant 0 : i32
    return %2, %c0_i32_0 : i32, i32
  }
  func.func @transform_1(%arg0: i32, %arg1: i32) -> (i32, i32) {
    %c1_i32 = arith.constant 1 : i32
    %0 = arith.muli %arg0, %c1_i32 : i32
    %1 = arith.addi %0, %arg1 : i32
    %c0_i32 = arith.constant 0 : i32
    %2 = arith.minsi %1, %c0_i32 : i32
    %c0_i32_0 = arith.constant 0 : i32
    %c0_i32_1 = arith.constant 0 : i32
    return %2, %c0_i32_0 : i32, i32
  }
  func.func @transform_2(%arg0: i32, %arg1: i32) -> (i32, i32, i32) {
    %c0_i32 = arith.constant 0 : i32
    %c0_i32_0 = arith.constant 0 : i32
    %c0_i32_1 = arith.constant 0 : i32
    return %arg0, %c0_i32, %c0_i32_0 : i32, i32, i32
  }
}

</mosaic_0001>

<bundles_post_ra>
// kernel: tpu_custom_call.1
= control target key start
LH: loop header
LB: loop body
LE: loop exit
PB: predicated region body
PF: predicated region fallthrough
CT: control target
= control target key end

     0   :  { %7 = vsyncpa [#allocation3], 0  ;;  %s762_s0 = inlined_call_operand.vmem [shape: f32[24,16], index: 0, kind: input, shape index: {}]   ;;  %s763_s1 = inlined_call_operand.vmem [shape: s8[24,16], index: 1, kind: input, shape index: {}]   ;;  %s764_s2 = inlined_call_operand.hbm [shape: f32[2,8,128], index: 2, kind: output, shape index: {}]  }
   0x1   :  { %9 = vsyncpa [#allocation3 + $0x1], 0  ;;  %s626_s9 = smov 0   ;;  %s628_s10 = smov 0  }
   0x2   :  { %s630_s11 = smov 0   ;;  %s632_s12 = smov 0  }
   0x3   :  { %s634_s13 = smov 0   ;;  %s636_s14 = smov 0  }
   0x4 LB: > { %s446_s15 = sadd.s32 4294967295, %s607_s14   ;;  %s447_s16 = sadd.s32 4294967294, %s607_s14   ;;  %s607_s14 = sphi %s636_s14, %s15_s14   ;;  %s603_s13 = sphi %s634_s13, %s773_s13   ;;  %s599_s12 = sphi %s632_s12, %s772_s12   ;;  %s595_s11 = sphi %s630_s11, %s771_s11   ;;  %s591_s10 = sphi %s628_s10, %s770_s10   ;;  %s587_s9 = sphi %s626_s9, %s769_s9  }
   0x5   : > { %s27_s17 = sadd.s32 1, %s603_s13  ;;  %s98_s18 = sadd.s32 1, %s595_s11 }
   0x6   : > { %p29_p0 = scmp.ge.s32.totalorder %s27_s17, 2  ;;  %p108_p1 = scmp.ne.s32.totalorder %s595_s11, %s591_s10 }
   0x7   : > { %p109_p2 = scmp.eq.s32.totalorder %s446_s15, 1  ;;  %p114_p3 = scmp.ne.s32.totalorder %s591_s10, %s587_s9 }
   0x8   : > { %s775_s17 = smov (%p29_p0, %s27_s17), 0  ;;  %p115_p5 = scmp.eq.s32.totalorder %s447_s16, 1 }
   0x9   : > { %p666_p4 = por %p109_p2, %p108_p1  ;;  %s95_s20 = ssub.s32 %s603_s13, %s775_s17 }
   0xa   : > { %p450_p6 = scmp.ge.s32.totalorder %s607_s14, 1  ;;  %p96_p7 = scmp.eq.s32.totalorder %s95_s20, 0 }
   0xb   : > { %p673_p8 = por %p115_p5, %p114_p3  ;;  %p163_p9 = scmp.lt.s32.totalorder %s607_s14, 3 }
   0xc   : > { %s679_s22 = scalar_select %p96_p7, %s595_s11, %s98_s18  }
   0xd   : > { %p164_p10 = pnand %p450_p6, %p163_p9 }
   0xe   : > { %p197_p11 = scmp.lt.s32.totalorder (!%p164_p10), %s599_s12, 0  ;;  %s228_s5 = smul.u32 (!%p164_p10), 24, %s599_s12 }
   0xf   : > { %167 = sbr.rel (%p164_p10) target bundleno = 432 (0x1b0), region = 28  ;;  %s193_s6 = sand.u32 (!%p164_p10), 1, %s591_s10  }
  0x10   : > { %s451_s7 = sshll.u32 (!%p164_p10), %s193_s6, 3  ;;  %s455_s16 = sshll.u32 (!%p164_p10), %s599_s12, 7 }
  0x11   : > { %s195_s20 = scalar_lea.vmem (!%p164_p10), [#allocation2], %s451_s7  ;;  %s354_s27 = scalar_lea.sflag (!%p164_p10), [#allocation3], %s193_s6 }
  0x14   : > { %s198_s23 = scalar_select %p197_p11, %s599_s12, 0  ;;  %v609_v12 = vmov 0   ;;  %v238_v15 = vlaneseq  ;;  %vm276_vm4 = vcmask 130048   ;;  %v242_v22 = vstv %s228_s5 }
  0x16   : > { %s199_s24 = smul.u32 3, %s198_s23  ;;  %v239_v20 = vshrl.u32 %v238_v15, 7  ;;  %s367_s23 = sshll.u32 %s195_s20, 4  ;;  %s368_s23 = int_to_ptr.vmem [resolvable:$true] %s367_s23 }
  0x17   : > { %s531_s28 = scalar_lea.vmem %s368_s23, 128 }
  0x18   : > { %p200_p12 = scmp.lt.s32.totalorder %s199_s24, 2  ;;  %v240_v25 = vadd.s32 8, %v239_v20  ;;  %v243_v29 = vadd.s32 %v242_v22, %v239_v20  ;;  %v241_v34 = vadd.s32 16, %v239_v20  ;;  %p532_p13 = scmp.ne.s32.totalorder %s368_s23, %s531_s28 }
  0x1a   : > { %s777_s24 = smov (!%p200_p12, %s199_s24), 2  ;;  %v244_v33 = vadd.s32 %v242_v22, %v240_v25  ;;  %vm765_vm7 = vcmp.lt.s32.totalorder %v243_v29, 24  ;;  %v245_v35 = vadd.s32 %v242_v22, %v241_v34  ;;  %p533_p0 = pnand %p532_p13, %p666_p4 }
  0x1b   : > { %s452_s25 = sshll.u32 %s777_s24, 3  ;;  %s453_s26 = sshll.u32 %s777_s24, 1  ;;  %vm255_vm9 = vmpackc.low %vm765_vm7, %vm765_vm7 }
  0x1c   : > { %s203_s29 = scalar_lea.vmem %s762_s0, %s452_s25  ;;  %s215_s4 = scalar_lea.vmem %s763_s1, %s453_s26  ;;  %vm247_vm8 = vcmp.lt.s32.totalorder %v244_v33, 24  ;;  %vm256_vm11 = vmpackc.even %vm255_vm9, %vm255_vm9  ;;  %vm248_vm12 = vcmp.lt.s32.totalorder %v245_v35, 24 }
  0x1d   : > { %v689_v0 = vld [vmem:[%s203_s29] sm:$0xff]  ;;  %v691_v1 = vld [vmem:[%s203_s29 + $0x8] sm:$0xff]  ;;  %v693_v2 = vld [vmem:[%s203_s29 + $0x10] sm:$0xff]  ;;  %s365_s26 = scalar_lea.hbm %s764_s2, %s455_s16  ;;  %p534_p1 = pneg %p533_p0 }
  0x1e   : > { %v291_v3 = vsub.f32 0.0, %v689_v0  ;;  %v292_v4 = vsub.f32 0.0, %v691_v1  ;;  %v293_v5 = vsub.f32 0.0, %v693_v2  ;;  %v232_v6 = vld [vmem:[%s215_s4] sm:$0x3]  ;;  %vm257_vm10 = vmpackc.low %vm247_vm8, %vm247_vm8  ;;  %s610_s29 = smov [#allocation2]  }
  0x1f   : > { %v233_v10 = vld [vmem:[%s215_s4 + $0x2] sm:$0x3]  ;;  %v234_v11 = vld [vmem:[%s215_s4 + $0x4] sm:$0x3]  ;;  %vm235_vm0 = vnez %v232_v6  ;;  %vm258_vm13 = vmpackc.even %vm257_vm10, %vm257_vm10  ;;  %s535_s30 = sshll.u32 %s610_s29, 4  ;;  %s536_s30 = int_to_ptr.vmem [resolvable:$false] %s535_s30 }
  0x20   : > { %v294_v7 = vmul.f32 1.442695, %v291_v3  ;;  %v296_v8 = vmul.f32 1.442695, %v292_v4  ;;  %v298_v9 = vmul.f32 1.442695, %v293_v5  ;;  %vm236_vm1 = vnez %v233_v10  ;;  %vm261_vm14 = vmand %vm235_vm0, %vm256_vm11  ;;  %p538_p2 = scmp.lt.s32.totalorder %s368_s23, %s536_s30 }
  0x21   : > { %vm237_vm2 = vnez %v234_v11  ;;  %v300_v13 = vsel %vm235_vm0, 16843009, %v609_v12  ;;  %v301_v14 = vsel %vm236_vm1, 16843009, %v609_v12  ;;  %vm259_vm15 = vmpackc.low %vm248_vm12, %vm248_vm12  ;;  %v264_v36 = vsel %vm261_vm14, 16843009, %v609_v12 }
  0x22   : > { %519 = vpow2.f32 %v294_v7  ;;  %v302_v16 = vsel %vm237_vm2, 16843009, %v609_v12  ;;  %v303_v17 = vunpack.c.0.s8 %v300_v13  ;;  %v304_v18 = vunpack.c.0.s8 %v301_v14  ;;  %s537_s12 = scalar_lea.vmem %s536_s30, 256 }
  0x23   : > { %521 = vpow2.f32 %v296_v8  ;;  %v305_v19 = vunpack.c.0.s8 %v302_v16  ;;  %v267_v38 = vunpack.c.0.s8 %v264_v36  ;;  %p539_p3 = scmp.lt.s32.totalorder %s537_s12, %s531_s28 }
  0x24   : > { %523 = vpow2.f32 %v298_v9  ;;  %vm306_vm3 = vcmp.ne.s32.totalorder %v303_v17, 0  ;;  %vm307_vm5 = vcmp.ne.s32.totalorder %v304_v18, 0 }
  0x25   : > { %vm308_vm6 = vcmp.ne.s32.totalorder %v305_v19, 0  ;;  %vm270_vm7 = vcmp.ne.s32.totalorder %v267_v38, 0  ;;  %p540_p5 = por %p539_p3, %p538_p2 }
  0x26   : > { %v273_v42 = vsel %vm270_vm7, %v689_v0, 0.0 }
  0x27   : > { %v277_v44 = vsel %vm276_vm4, %v273_v42, 0.0  ;;  %p541_p6 = pnand %p540_p5, %p534_p1 }
  0x2f   : > { %v520_v21 = vpop.eup %519 }
  0x30   : > { %v522_v23 = vpop.eup %521  ;;  %v309_v24 = vsel %vm306_vm3, 0.0, %v520_v21  ;;  %vm262_vm3 = vmand %vm236_vm1, %vm258_vm13  ;;  %vm768_vm1 = vcmp.lt.s32.totalorder %v243_v29, 24 }
  0x31   : > { %v524_v26 = vpop.eup %523  ;;  %v312_v27 = vsel %vm276_vm4, %v309_v24, 0.0  ;;  %v310_v28 = vsel %vm307_vm5, 0.0, %v522_v23  ;;  %v265_v37 = vsel %vm262_vm3, 16843009, %v609_v12  ;;  %vm260_vm5 = vmpackc.even %vm259_vm15, %vm259_vm15 }
  0x32   : > { %313 = vadd.xlane.f32.xlu0 %v312_v27  ;;  %v311_v30 = vsel %vm308_vm6, 0.0, %v524_v26  ;;  %v315_v31 = vsel %vm276_vm4, %v310_v28, 0.0  ;;  %v268_v39 = vunpack.c.0.s8 %v265_v37  ;;  %vm263_vm6 = vmand %vm237_vm2, %vm260_vm5  ;;  %vm333_vm2 = vcmask 7168  }
  0x33   : > { %v318_v32 = vsel %vm276_vm4, %v311_v30, 0.0  ;;  %v266_v40 = vsel %vm263_vm6, 16843009, %v609_v12 }
  0x34   : > { %319 = vadd.xlane.f32.xlu1 %v318_v32  ;;  %v269_v41 = vunpack.c.0.s8 %v266_v40  ;;  %vm271_vm9 = vcmp.ne.s32.totalorder %v268_v39, 0 }
  0x35   : > { %v274_v43 = vsel %vm271_vm9, %v691_v1, 0.0 }
  0x36   : > { %316 = vadd.xlane.f32.xlu0 %v315_v31  ;;  %vm272_vm0 = vcmp.ne.s32.totalorder %v269_v41, 0  ;;  %v278_v45 = vsel %vm276_vm4, %v274_v43, 0.0 }
  0x37   : > { %v275_v46 = vsel %vm272_vm0, %v693_v2, 0.0  ;;  %v279_v47 = vadd.f32 %v278_v45, %v277_v44 }
  0x38   : > { %v280_v48 = vsel %vm276_vm4, %v275_v46, 0.0 }
  0x39   : > { %v281_v49 = vadd.f32 %v280_v48, %v279_v47 }
  0x3b   : > { %282 = vadd.xlane.f32.xlu1 %v281_v49 }
  0xbb   : > { %v314_v50 = vpop.xlane.xlu0 %313 }
  0xbc   : > { %v321_v51 = vadd.f32 1e-07, %v314_v50 }
  0xbd   : > { %v320_v52 = vpop.xlane.xlu1 %319 }
  0xbe   : > { %525 = vlog2.f32 %v321_v51  ;;  %v323_v53 = vadd.f32 1e-07, %v320_v52 }
  0xbf   : > { %v317_v54 = vpop.xlane.xlu0 %316 }
  0xc0   : > { %v322_v55 = vadd.f32 1e-07, %v317_v54  ;;  %527 = vlog2.f32 %v323_v53 }
  0xc2   : > { %529 = vlog2.f32 %v322_v55 }
  0xc4   : > { %v283_v6 = vpop.xlane.xlu1 %282 }
  0xc5   : > { %v284_v7 = vrot.slane %v283_v6, 4 }
  0xc7   : > { %v285_v8 = vadd.f32 %v284_v7, %v283_v6 }
  0xc9   : > { %v286_v9 = vrot.slane %v285_v8, 2 }
  0xcb   : > { %v526_v56 = vpop.eup %525  ;;  %v287_v10 = vadd.f32 %v286_v9, %v285_v8 }
  0xcc   : > { %v325_v57 = vmul.f32 0.6931472, %v526_v56 }
  0xcd   : > { %v528_v58 = vpop.eup %527  ;;  %v288_v11 = vrot.slane %v287_v10, 1 }
  0xce   : > { %v329_v59 = vmul.f32 0.6931472, %v528_v58  ;;  %v330_v62 = vsel %vm768_vm1, %v325_v57, 0.0 }
  0xcf   : > { %v530_v60 = vpop.eup %529  ;;  %v334_v1 = vsel %vm333_vm2, %v330_v62, 0.0  ;;  %v289_v12 = vadd.f32 %v288_v11, %v287_v10 }
  0xd0   : > { %v327_v61 = vmul.f32 0.6931472, %v530_v60  ;;  %v332_v63 = vsel %vm248_vm12, %v329_v59, 0.0 }
  0xd1   : > { %v337_v3 = vsel %vm333_vm2, %v332_v63, 0.0  ;;  %458 = vpush %v289_v12 }
  0xd2   : > { %v331_v0 = vsel %vm247_vm8, %v327_v61, 0.0 }
  0xd3   : > { %v335_v2 = vsel %vm333_vm2, %v331_v0, 0.0 }
  0xd4   : > { %v336_v4 = vadd.f32 %v335_v2, %v334_v1 }
  0xd6   : > { %v338_v5 = vadd.f32 %v337_v3, %v336_v4 }
  0xd8   : > { %339 = vadd.xlane.f32.xlu0 %v338_v5 }
 0x102   : > { %s459_s8 = spop %458 }
 0x161   : > { %v340_v13 = vpop.xlane.xlu0 %339 }
 0x162   : > { %v341_v14 = vrot.slane %v340_v13, 4 }
 0x164   : > { %v342_v15 = vadd.f32 %v341_v14, %v340_v13 }
 0x166   : > { %v343_v16 = vrot.slane %v342_v15, 2 }
 0x168   : > { %v344_v17 = vadd.f32 %v343_v16, %v342_v15 }
 0x16a   : > { %v345_v18 = vrot.slane %v344_v17, 1 }
 0x16c   : > { %v346_v19 = vadd.f32 %v345_v18, %v344_v17 }
 0x16e   : > { %460 = vpush %v346_v19 }
 0x19f   : > { %s461_s15 = spop %460 }
 0x1a0   : > { %s349_s18 = sadd.f32 %s461_s15, %s459_s8 }
 0x1a2   : > { %v350_v20 = vstv %s349_s18 }
 0x1a3   : > { %352 = vst [vmem:[%s195_s20] sm:$0xff] %v350_v20 }
 0x1a4   : > { %544 = shalt.err (!%p541_p6)
}
 0x1a5   : > { %s545_s3 = scalar_lea.hbm %s365_s26, 128  ;;  %s549_s6 = scalar_lea.hbm %s764_s2, 256 }
 0x1a6   : > { %p546_p7 = scmp.ne.s32.totalorder %s365_s26, %s545_s3  ;;  %p550_p11 = scmp.lt.s32.totalorder %s365_s26, %s764_s2 }
 0x1a7   : > { %p551_p12 = scmp.lt.s32.totalorder %s549_s6, %s545_s3 }
 0x1a8   : > { %p547_p9 = pnand %p546_p7, %p666_p4 }
 0x1a9   : > { %p552_p13 = por %p551_p12, %p550_p11 }
 0x1aa   : > { %p548_p10 = pneg %p547_p9 }
 0x1ac   : > { %p553_p0 = pnand %p552_p13, %p548_p10 }
 0x1ae   : > { %556 = shalt.err (!%p553_p0)
}
 0x1af   : > { %462 = dma.vmem_to_hbm [thread:$0]  (%p666_p4), %s368_s23, 128, %s365_s26, %s354_s27  }
 0x1b0 PF: > { %p468_p1 = scmp.ge.s32.totalorder %s607_s14, 2  ;;  %s379_s15 = sand.u32 1, %s587_s9  }
 0x1b1   : > { %s380_s16 = scalar_lea.sflag [#allocation3], %s379_s15 }
 0x1b2   : > { %p465_p2 = pnand %p468_p1, %p673_p8 }
 0x1b4   : > { %p466_p3 = pneg %p465_p2 }
 0x1b6   : > { %582 = dma.done.wait (%p466_p3), %s380_s16, 128  }
 0x1b7   : > { %584 = vsyncadd (%p466_p3), %s380_s16, 4294967168  ;;  %s15_s14 = sadd.s32 1, %s607_s14   ;;  %s769_s9 = smov %s591_s10 }
 0x1b8   : > { %p12_p5 = scmp.ge.s32.totalorder %s15_s14, 4   ;;  %s770_s10 = smov %s595_s11 }
 0x1b9   : > { %s771_s11 = smov %s679_s22  ;;  %s772_s12 = smov %s603_s13 }
 0x1ba   : > { %s773_s13 = smov %s775_s17  ;;  %14 = sbr.rel (!%p12_p5) target bundleno = 4 (0x4), region = 70 }
 0x1bf   :  { %385 = vsyncpa [#allocation3], 1 }
 0x1c0   :  { %387 = vsyncpa [#allocation3 + $0x1], 1 }

</bundles_post_ra>
